<compile_context>
chip_gen: v5e
topology: v5e:2x2
jax: 0.10.0
libtpu: 0.0.40
codegen_flags: <defaults>
</compile_context>

<pallas_src>
import numpy as np
import jax
import jax.numpy as jnp
from jax.experimental import pallas as pl
from jax.experimental.pallas import tpu as pltpu


# ----------------------------------------------------------------------------
# Exact linear-operator constants (host-side glue, no activation compute).
# ----------------------------------------------------------------------------
def _round_up(x: int, m: int) -> int:
    return ((x + m - 1) // m) * m


def _adaptive_pool_matrix_1d(in_size: int, out_size: int) -> np.ndarray:
    """Row i averages input range [floor(i*in/out), ceil((i+1)*in/out))."""
    P = np.zeros((out_size, in_size), dtype=np.float32)
    for i in range(out_size):
        start = (i * in_size) // out_size
        end = -((-(i + 1) * in_size) // out_size)  # ceil((i+1)*in/out)
        P[i, start:end] = 1.0 / float(end - start)
    return P


def _bilinear_upsample_matrix_1d(in_size: int, out_size: int) -> np.ndarray:
    """align_corners=True bilinear interpolation weights (out_size, in_size)."""
    U = np.zeros((out_size, in_size), dtype=np.float32)
    for i in range(out_size):
        if out_size == 1 or in_size == 1:
            src = 0.0
        else:
            src = i * (in_size - 1) / (out_size - 1)
        i0 = min(int(np.floor(src)), in_size - 1)
        i1 = min(i0 + 1, in_size - 1)
        w1 = src - i0
        U[i, i0] += 1.0 - w1
        U[i, i1] += w1
    return U


def _build_pool_upsample_operators(H, W, setting):
    """Concatenated, 8-row zero-padded pooling / upsample operators (all branches).

    Returns PT (HW, S2p), UT (S2p, HW), per-branch padded bin counts.
    Zero-padded rows/cols are exact no-ops in the matmuls.
    """
    HW = H * W
    p_rows, ut_rows, padded_sizes = [], [], []
    for s in setting:
        P2 = np.kron(_adaptive_pool_matrix_1d(H, s),
                     _adaptive_pool_matrix_1d(W, s))          # (s*s, HW)
        U2 = np.kron(_bilinear_upsample_matrix_1d(s, H),
                     _bilinear_upsample_matrix_1d(s, W))      # (HW, s*s)
        s2 = s * s
        s2p = _round_up(s2, 8)
        Pp = np.zeros((s2p, HW), dtype=np.float32)
        Pp[:s2] = P2
        UTp = np.zeros((s2p, HW), dtype=np.float32)
        UTp[:s2] = U2.T
        p_rows.append(Pp)
        ut_rows.append(UTp)
        padded_sizes.append(s2p)
    P_cat = np.concatenate(p_rows, axis=0)                    # (S2p, HW)
    UT_cat = np.concatenate(ut_rows, axis=0)                  # (S2p, HW)
    PT_cat = np.ascontiguousarray(P_cat.T)                    # (HW, S2p)
    return PT_cat, UT_cat, tuple(padded_sizes)


# ----------------------------------------------------------------------------
# Kernel A: streaming adaptive-pool accumulation + stacked 1x1 conv + BN + ReLU.
# ----------------------------------------------------------------------------
def _make_pool_conv_kernel(compute_dtype):
    def kernel(x_ref, pt_ref, w_ref, bias_ref, mask_ref, act_ref, pooled_ref):
        # x_ref:    (Cin, T)         lane tile of one image (compute dtype)
        # pt_ref:   (T, S2p)         lane-tile rows of the pooling operator
        # w_ref:    (nb*Cred, Cin)   stacked BN-scale-folded 1x1 conv weights
        # bias_ref: (nb*Cred, 1)     folded BN shift (f32)
        # mask_ref: (nb*Cred, S2p)   block-diagonal 0/1 mask (f32)
        # act_ref:  (nb*Cred, S2p)   output activations (compute dtype)
        # pooled_ref: VMEM scratch (Cin, S2p) f32 accumulator
        t = pl.program_id(1)

        @pl.when(t == 0)
        def _():
            pooled_ref[...] = jnp.zeros_like(pooled_ref)

        # One MXU matmul pools all branches for this lane tile; f32 accumulate.
        pooled_ref[...] += jnp.dot(x_ref[...], pt_ref[...],
                                   preferred_element_type=jnp.float32)

        @pl.when(t == pl.num_programs(1) - 1)
        def _():
            # Single stacked conv matmul (cast hoisted out of any branch loop).
            conv = jnp.dot(w_ref[...], pooled_ref[...].astype(compute_dtype),
                           preferred_element_type=jnp.float32)   # (nb*Cred, S2p)
            # BN shift + ReLU in f32, then zero every off-block column so the
            # fused upsample matmul in kernel B cannot leak across branches.
            act = jnp.maximum(conv + bias_ref[...], 0.0) * mask_ref[...]
            act_ref[...] = act.astype(act_ref.dtype)

    return kernel


# ----------------------------------------------------------------------------
# Kernel B: fused bilinear upsample of all branches + identity passthrough.
# ----------------------------------------------------------------------------
def _make_upsample_concat_kernel(cin, n_branch_ch):
    def kernel(x_ref, act_ref, ut_ref, o_ref):
        # x_ref:   (Cin, T)          lane tile of x in the OUTPUT dtype (exact passthrough)
        # act_ref: (nb*Cred, S2p)    masked activations (compute dtype)
        # ut_ref:  (S2p, T)          lane-tile columns of the upsample operator
        # o_ref:   (Cin + nb*Cred, T)
        o_ref[pl.ds(0, cin), :] = x_ref[...].astype(o_ref.dtype)
        up = jnp.dot(act_ref[...], ut_ref[...],
                     preferred_element_type=jnp.float32)          # (nb*Cred, T)
        o_ref[pl.ds(cin, n_branch_ch), :] = up.astype(o_ref.dtype)

    return kernel


# ----------------------------------------------------------------------------
# Module wrapper (mirrors _PyramidPoolingModule.forward, eval-mode BN).
# ----------------------------------------------------------------------------
def pyramid_pooling_forward(x_nchw, branch_params, setting,
                            compute_dtype=jnp.bfloat16,
                            out_dtype=None,
                            lane_tile=512,
                            vmem_limit_bytes=48 * 1024 * 1024):
    """Fused PPM forward. Returns (N, Cin + len(setting)*Cred, H, W).

    compute_dtype: dtype of x / operator constants fed to the matmuls (default
      bf16: halves x DMA and uses the bf16 MXU). Accumulation, BN shift, ReLU
      and masking stay f32.
    out_dtype: output dtype (default: x's dtype). The identity passthrough is
      read in this dtype, so with f32 in/out it is bit-exact.
    lane_tile: spatial lane tile (multiple of 128). HW is zero-padded to a
      multiple of it (padded columns are exact no-ops and sliced off).
    """
    N, Cin, H, W = x_nchw.shape
    HW = H * W
    cdt = x_nchw.dtype if compute_dtype is None else compute_dtype
    odt = x_nchw.dtype if out_dtype is None else out_dtype

    assert lane_tile % 128 == 0, "lane_tile must be a multiple of 128"
    tile = min(int(lane_tile), _round_up(HW, 128))
    HW_pad = _round_up(HW, tile)
    n_tiles = HW_pad // tile

    # Exact pooling / upsample operators, zero-padded to HW_pad (exact no-ops).
    PT_np, UT_np, padded_sizes = _build_pool_upsample_operators(H, W, setting)
    if HW_pad != HW:
        PT_np = np.pad(PT_np, ((0, HW_pad - HW), (0, 0)))
        UT_np = np.pad(UT_np, ((0, 0), (0, HW_pad - HW)))
    S2p = PT_np.shape[1]
    PT = jnp.asarray(PT_np, dtype=cdt)       # (HW_pad, S2p)
    UT = jnp.asarray(UT_np, dtype=cdt)       # (S2p, HW_pad)

    # Fold eval-mode BN scale into the conv weight; keep only the shift.
    eps = 1e-5
    wt_list, bias_list = [], []
    for (Wc, gamma, beta, run_mean, run_var) in branch_params:
        scale = gamma / jnp.sqrt(run_var + eps)                    # (Cred,)
        bias = beta - run_mean * scale                             # (Cred,)
        wt_list.append(jnp.transpose(Wc * scale[None, :], (1, 0)))  # (Cred, Cin)
        bias_list.append(bias[:, None])                            # (Cred, 1)
    W_flat = jnp.concatenate(wt_list, axis=0).astype(cdt)          # (nb*Cred, Cin)
    bias_flat = jnp.concatenate(bias_list, axis=0).astype(jnp.float32)  # (nb*Cred, 1)

    nb = len(setting)
    Cred = wt_list[0].shape[0]
    nbCred = nb * Cred
    C_total = Cin + nbCred

    # Block-diagonal mask: branch b's rows keep only its own pooled-bin columns.
    mask_np = np.zeros((nbCred, S2p), dtype=np.float32)
    off = 0
    for b, sz in enumerate(padded_sizes):
        mask_np[b * Cred:(b + 1) * Cred, off:off + sz] = 1.0
        off += sz
    MASK = jnp.asarray(mask_np)

    # Channels-first flatten: pure reshape, no transpose. Zero-pad lanes if needed.
    x_flat = x_nchw.reshape(N, Cin, HW)

    def _prep(dt):
        arr = x_flat.astype(dt)
        if HW_pad != HW:
            arr = jnp.pad(arr, ((0, 0), (0, 0), (0, HW_pad - HW)))
        return arr

    x_a = _prep(cdt)                                    # matmul operand
    x_b = x_a if np.dtype(odt) == np.dtype(cdt) else _prep(odt)   # exact passthrough

    cp_a = pltpu.CompilerParams(
        dimension_semantics=("parallel", "arbitrary"),
        vmem_limit_bytes=vmem_limit_bytes)
    cp_b = pltpu.CompilerParams(
        dimension_semantics=("parallel", "parallel"),
        vmem_limit_bytes=vmem_limit_bytes)

    # --- Kernel A: pooled accumulation over HW tiles + stacked conv/BN/ReLU ---
    act = pl.pallas_call(
        _make_pool_conv_kernel(cdt),
        out_shape=jax.ShapeDtypeStruct((N, nbCred, S2p), cdt),
        grid_spec=pltpu.PrefetchScalarGridSpec(
            num_scalar_prefetch=0,
            grid=(N, n_tiles),
            in_specs=[
                pl.BlockSpec((None, Cin, tile), lambda n, t: (n, 0, t)),
                pl.BlockSpec((tile, S2p), lambda n, t: (t, 0)),
                pl.BlockSpec((nbCred, Cin), lambda n, t: (0, 0)),
                pl.BlockSpec((nbCred, 1), lambda n, t: (0, 0)),
                pl.BlockSpec((nbCred, S2p), lambda n, t: (0, 0)),
            ],
            out_specs=pl.BlockSpec((None, nbCred, S2p), lambda n, t: (n, 0, 0)),
            scratch_shapes=[pltpu.VMEM((Cin, S2p), jnp.float32)],
        ),
        compiler_params=cp_a,
    )(x_a, PT, W_flat, bias_flat, MASK)

    # --- Kernel B: fused upsample + identity passthrough, both axes parallel ---
    out = pl.pallas_call(
        _make_upsample_concat_kernel(Cin, nbCred),
        out_shape=jax.ShapeDtypeStruct((N, C_total, HW_pad), odt),
        grid_spec=pltpu.PrefetchScalarGridSpec(
            num_scalar_prefetch=0,
            grid=(N, n_tiles),
            in_specs=[
                pl.BlockSpec((None, Cin, tile), lambda n, t: (n, 0, t)),
                pl.BlockSpec((None, nbCred, S2p), lambda n, t: (n, 0, 0)),
                pl.BlockSpec((S2p, tile), lambda n, t: (0, t)),
            ],
            out_specs=pl.BlockSpec((None, C_total, tile), lambda n, t: (n, 0, t)),
        ),
        compiler_params=cp_b,
    )(x_b, act, UT)

    if HW_pad != HW:
        out = out[:, :, :HW]
    return out.reshape(N, C_total, H, W)


# ----------------------------------------------------------------------------
# Pure-JAX reference (identical math, independent plumbing) for validation.
# ----------------------------------------------------------------------------
def reference_forward(x_nchw, branch_params, setting):
    N, Cin, H, W = x_nchw.shape
    x_flat = jnp.transpose(x_nchw, (0, 2, 3, 1)).reshape(N, H * W, Cin)
    outs = [x_nchw]
    for s, (Wc, gamma, beta, run_mean, run_var) in zip(setting, branch_params):
        P2 = jnp.asarray(np.kron(_adaptive_pool_matrix_1d(H, s),
                                 _adaptive_pool_matrix_1d(W, s)))
        U2 = jnp.asarray(np.kron(_bilinear_upsample_matrix_1d(s, H),
                                 _bilinear_upsample_matrix_1d(s, W)))
        eps = 1e-5
        scale = gamma / jnp.sqrt(run_var + eps)
        bias = beta - run_mean * scale
        pooled = jnp.einsum("pq,nqc->npc", P2, x_flat)
        conv = jnp.einsum("npc,cd->npd", pooled, Wc)
        act = jnp.maximum(conv * scale[None, None, :] + bias[None, None, :], 0.0)
        up = jnp.einsum("qp,npd->nqd", U2, act)
        outs.append(jnp.transpose(up.reshape(N, H, W, -1), (0, 3, 1, 2)))
    return jnp.concatenate(outs, axis=1)


if __name__ == "__main__":
    # Small shapes consistent with the module: x is NCHW.
    N, C_IN, H, W = 2, 16, 16, 16
    C_RED = 4
    SETTING = (1, 2, 3, 6)

    key = jax.random.PRNGKey(0)
    key, xkey = jax.random.split(key)
    x = jax.random.normal(xkey, (N, C_IN, H, W), dtype=jnp.float32)

    # Deterministic parameter init per branch:
    #   conv weight: (Cred, Cin, 1, 1) in PyTorch -> stored here as (Cin, Cred)
    #   BN: gamma, beta, running_mean, running_var (eval-mode stats)
    branch_params = []
    for b, s in enumerate(SETTING):
        key, wkey = jax.random.split(key)
        w_torch = 0.1 * jax.random.normal(wkey, (C_RED, C_IN), dtype=jnp.float32)
        Wc = jnp.transpose(w_torch, (1, 0))                       # (Cin, Cred)
        gamma = 1.0 + 0.10 * jnp.arange(C_RED, dtype=jnp.float32)
        beta = 0.05 * jnp.arange(C_RED, dtype=jnp.float32) - 0.1
        run_mean = 0.01 * (b + 1) * jnp.arange(C_RED, dtype=jnp.float32)
        run_var = 1.0 + 0.02 * jnp.arange(C_RED, dtype=jnp.float32)
        branch_params.append((Wc, gamma, beta, run_mean, run_var))

    expected_channels = C_IN + len(SETTING) * C_RED
    ref = jax.block_until_ready(reference_forward(x, branch_params, SETTING))

    # 1) f32 compute path: exact (tight tolerance).
    out_f32 = jax.block_until_ready(
        pyramid_pooling_forward(x, branch_params, SETTING,
                                compute_dtype=jnp.float32))
    assert out_f32.shape == (N, expected_channels, H, W), out_f32.shape
    np.testing.assert_allclose(np.asarray(out_f32), np.asarray(ref),
                               rtol=1e-5, atol=1e-5)

    # 2) Default path: bf16 compute, f32 output. Branch channels loose check;
    #    identity passthrough must be bit-exact (read/stored in the output dtype).
    out_def = jax.block_until_ready(
        pyramid_pooling_forward(x, branch_params, SETTING))
    assert out_def.shape == (N, expected_channels, H, W), out_def.shape
    np.testing.assert_array_equal(np.asarray(out_def[:, :C_IN]), np.asarray(x))
    np.testing.assert_allclose(np.asarray(out_def), np.asarray(ref),
                               rtol=5e-2, atol=1e-1)

    # 3) bf16 compute + bf16 output (halves the dominant output traffic).
    out_bf16 = jax.block_until_ready(
        pyramid_pooling_forward(x, branch_params, SETTING,
                                out_dtype=jnp.bfloat16))
    assert out_bf16.shape == (N, expected_channels, H, W), out_bf16.shape
    assert out_bf16.dtype == jnp.bfloat16, out_bf16.dtype
    np.testing.assert_allclose(np.asarray(out_bf16).astype(np.float32),
                               np.asarray(ref), rtol=5e-2, atol=1e-1)

    print("KERNEL_OK")
</pallas_src>

<mosaic_0001>
module attributes {stable_mosaic.version = 11 : i64} {
  func.func @kernel(%arg0: i32, %arg1: i32, %arg2: memref<1x16x256xf32, #tpu.memory_space<vmem>>, %arg3: memref<256x72xf32, #tpu.memory_space<vmem>>, %arg4: memref<16x16xf32, #tpu.memory_space<vmem>>, %arg5: memref<16x1xf32, #tpu.memory_space<vmem>>, %arg6: memref<16x72xf32, #tpu.memory_space<vmem>>, %arg7: memref<1x16x72xf32, #tpu.memory_space<vmem>>, %arg8: memref<16x72xf32, #tpu.memory_space<vmem>>) attributes {dimension_semantics = [#tpu.dimension_semantics<parallel>, #tpu.dimension_semantics<arbitrary>], iteration_bounds = array<i64: 2, 1>, scalar_prefetch = 0 : i64, scratch_operands = 1 : i64, tpu.core_type = #tpu.core_type<tc>, window_params = [{transform_indices = @transform_0, window_bounds = array<i64: 1, 16, 256>}, {transform_indices = @transform_1, window_bounds = array<i64: 256, 72>}, {pipeline_mode = #tpu.pipeline_mode<synchronous>, transform_indices = @transform_2, window_bounds = array<i64: 16, 16>}, {pipeline_mode = #tpu.pipeline_mode<synchronous>, transform_indices = @transform_3, window_bounds = array<i64: 16, 1>}, {pipeline_mode = #tpu.pipeline_mode<synchronous>, transform_indices = @transform_4, window_bounds = array<i64: 16, 72>}, {transform_indices = @transform_5, window_bounds = array<i64: 1, 16, 72>}]} {
    %c0_i32 = arith.constant 0 : i32
    %0 = arith.cmpi eq, %arg1, %c0_i32 : i32
    %1 = arith.extui %0 : i1 to i32
    %c0_i32_0 = arith.constant 0 : i32
    %2 = arith.cmpi ne, %1, %c0_i32_0 : i32
    scf.if %2 {
      %cst_11 = arith.constant 0.000000e+00 : f32
      %13 = vector.broadcast %cst_11 : f32 to vector<16x72xf32>
      %c0_12 = arith.constant 0 : index
      %c0_13 = arith.constant 0 : index
      %14 = vector.load %arg8[%c0_12, %c0_13] : memref<16x72xf32, #tpu.memory_space<vmem>>, vector<16x72xf32>
      tpu.vector_store %arg8[%c0_12, %c0_13], %13 {strides = array<i32>} : memref<16x72xf32, #tpu.memory_space<vmem>>, vector<16x72xf32>,
    } else {
    }
    %c0 = arith.constant 0 : index
    %c0_1 = arith.constant 0 : index
    %3 = vector.load %arg8[%c0, %c0_1] : memref<16x72xf32, #tpu.memory_space<vmem>>, vector<16x72xf32>
    %c0_2 = arith.constant 0 : index
    %c0_3 = arith.constant 0 : index
    %c0_4 = arith.constant 0 : index
    %4 = vector.load %arg2[%c0_2, %c0_3, %c0_4] : memref<1x16x256xf32, #tpu.memory_space<vmem>>, vector<1x16x256xf32>
    %5 = vector.shape_cast %4 : vector<1x16x256xf32> to vector<16x256xf32>
    %c0_5 = arith.constant 0 : index
    %c0_6 = arith.constant 0 : index
    %6 = vector.load %arg3[%c0_5, %c0_6] : memref<256x72xf32, #tpu.memory_space<vmem>>, vector<256x72xf32>
    %cst = arith.constant dense<0.000000e+00> : vector<16x72xf32>
    %7 = tpu.matmul %5, %6, %cst {dimension_numbers = #tpu.dot_dimension_numbers<[1], [0], [0], [1], [0, 0, 1, 1], [], []>} : vector<16x256xf32>, vector<256x72xf32>, vector<16x72xf32> -> vector<16x72xf32>
    %8 = arith.addf %3, %7 : vector<16x72xf32>
    %c0_7 = arith.constant 0 : index
    %c0_8 = arith.constant 0 : index
    %9 = vector.load %arg8[%c0_7, %c0_8] : memref<16x72xf32, #tpu.memory_space<vmem>>, vector<16x72xf32>
    tpu.vector_store %arg8[%c0_7, %c0_8], %8 {strides = array<i32>} : memref<16x72xf32, #tpu.memory_space<vmem>>, vector<16x72xf32>,
    %c0_i32_9 = arith.constant 0 : i32
    %10 = arith.cmpi eq, %arg1, %c0_i32_9 : i32
    %11 = arith.extui %10 : i1 to i32
    %c0_i32_10 = arith.constant 0 : i32
    %12 = arith.cmpi ne, %11, %c0_i32_10 : i32
    scf.if %12 {
      %c0_11 = arith.constant 0 : index
      %c0_12 = arith.constant 0 : index
      %13 = vector.load %arg4[%c0_11, %c0_12] : memref<16x16xf32, #tpu.memory_space<vmem>>, vector<16x16xf32>
      %c0_13 = arith.constant 0 : index
      %c0_14 = arith.constant 0 : index
      %14 = vector.load %arg8[%c0_13, %c0_14] : memref<16x72xf32, #tpu.memory_space<vmem>>, vector<16x72xf32>
      %cst_15 = arith.constant dense<0.000000e+00> : vector<16x72xf32>
      %15 = tpu.matmul %13, %14, %cst_15 {dimension_numbers = #tpu.dot_dimension_numbers<[1], [0], [0], [1], [0, 0, 1, 1], [], []>} : vector<16x16xf32>, vector<16x72xf32>, vector<16x72xf32> -> vector<16x72xf32>
      %c0_16 = arith.constant 0 : index
      %c0_17 = arith.constant 0 : index
      %16 = vector.load %arg5[%c0_16, %c0_17] : memref<16x1xf32, #tpu.memory_space<vmem>>, vector<16x1xf32>
      %17 = vector.broadcast %16 : vector<16x1xf32> to vector<16x72xf32>
      %18 = arith.addf %15, %17 : vector<16x72xf32>
      %cst_18 = arith.constant 0.000000e+00 : f32
      %19 = vector.broadcast %cst_18 : f32 to vector<16x72xf32>
      %20 = arith.maximumf %18, %19 : vector<16x72xf32>
      %c0_19 = arith.constant 0 : index
      %c0_20 = arith.constant 0 : index
      %21 = vector.load %arg6[%c0_19, %c0_20] : memref<16x72xf32, #tpu.memory_space<vmem>>, vector<16x72xf32>
      %22 = arith.mulf %20, %21 : vector<16x72xf32>
      %c0_21 = arith.constant 0 : index
      %c0_22 = arith.constant 0 : index
      %c0_23 = arith.constant 0 : index
      %23 = vector.load %arg7[%c0_21, %c0_22, %c0_23] : memref<1x16x72xf32, #tpu.memory_space<vmem>>, vector<1x16x72xf32>
      %24 = vector.shape_cast %23 : vector<1x16x72xf32> to vector<16x72xf32>
      %25 = vector.shape_cast %22 : vector<16x72xf32> to vector<1x16x72xf32>
      tpu.vector_store %arg7[%c0_21, %c0_22, %c0_23], %25 {strides = array<i32>} : memref<1x16x72xf32, #tpu.memory_space<vmem>>, vector<1x16x72xf32>,
    } else {
    }
    return
  }
  func.func @transform_0(%arg0: i32, %arg1: i32) -> (i32, i32, i32) {
    %c0_i32 = arith.constant 0 : i32
    %c0_i32_0 = arith.constant 0 : i32
    return %arg0, %c0_i32, %arg1 : i32, i32, i32
  }
  func.func @transform_1(%arg0: i32, %arg1: i32) -> (i32, i32) {
    %c0_i32 = arith.constant 0 : i32
    %c0_i32_0 = arith.constant 0 : i32
    return %arg1, %c0_i32 : i32, i32
  }
  func.func @transform_2(%arg0: i32, %arg1: i32) -> (i32, i32) {
    %c0_i32 = arith.constant 0 : i32
    %c0_i32_0 = arith.constant 0 : i32
    %c0_i32_1 = arith.constant 0 : i32
    return %c0_i32, %c0_i32_0 : i32, i32
  }
  func.func @transform_3(%arg0: i32, %arg1: i32) -> (i32, i32) {
    %c0_i32 = arith.constant 0 : i32
    %c0_i32_0 = arith.constant 0 : i32
    %c0_i32_1 = arith.constant 0 : i32
    return %c0_i32, %c0_i32_0 : i32, i32
  }
  func.func @transform_4(%arg0: i32, %arg1: i32) -> (i32, i32) {
    %c0_i32 = arith.constant 0 : i32
    %c0_i32_0 = arith.constant 0 : i32
    %c0_i32_1 = arith.constant 0 : i32
    return %c0_i32, %c0_i32_0 : i32, i32
  }
  func.func @transform_5(%arg0: i32, %arg1: i32) -> (i32, i32, i32) {
    %c0_i32 = arith.constant 0 : i32
    %c0_i32_0 = arith.constant 0 : i32
    %c0_i32_1 = arith.constant 0 : i32
    return %arg0, %c0_i32, %c0_i32_0 : i32, i32, i32
  }
}

</mosaic_0001>

<bundles_post_ra>
// kernel: tpu_custom_call.1
= control target key start
LH: loop header
LB: loop body
LE: loop exit
PB: predicated region body
PF: predicated region fallthrough
CT: control target
= control target key end

     0   :  { %10 = vsyncpa [#allocation4], 0  ;;  %s958_s0 = inlined_call_operand.vmem [shape: f32[2,16,256], index: 0, kind: input, shape index: {}]   ;;  %s959_s1 = inlined_call_operand.vmem [shape: f32[256,72], index: 1, kind: input, shape index: {}]   ;;  %s960_s2 = inlined_call_operand.vmem [shape: f32[16,16], index: 2, kind: input, shape index: {}]   ;;  %s961_s3 = inlined_call_operand.vmem [shape: f32[16,1], index: 3, kind: input, shape index: {}]   ;;  %s962_s4 = inlined_call_operand.vmem [shape: f32[16,72], index: 4, kind: input, shape index: {}]   ;;  %s963_s5 = inlined_call_operand.hbm [shape: f32[2,16,72], index: 5, kind: output, shape index: {}]  }
   0x1   :  { %12 = vsyncpa [#allocation4 + $0x1], 0  ;;  %s741_s18 = smov 0   ;;  %s743_s19 = smov 0  }
   0x2   :  { %s745_s20 = smov 0   ;;  %s747_s21 = smov 0  }
   0x3   :  { %s749_s22 = smov 0   ;;  %s751_s23 = smov 0  }
   0x4 LB: > { %s533_s24 = sadd.s32 4294967295, %s705_s23   ;;  %s534_s25 = sadd.s32 4294967294, %s705_s23   ;;  %s705_s23 = sphi %s751_s23, %s18_s23   ;;  %s701_s22 = sphi %s749_s22, %s970_s22   ;;  %s697_s21 = sphi %s747_s21, %s969_s21   ;;  %s693_s20 = sphi %s745_s20, %s968_s20   ;;  %s689_s19 = sphi %s743_s19, %s967_s19   ;;  %s685_s18 = sphi %s741_s18, %s966_s18  }
   0x5   : > { %s30_s26 = sadd.s32 1, %s701_s22  ;;  %s154_s27 = sadd.s32 1, %s693_s20 }
   0x6   : > { %p32_p0 = scmp.ge.s32.totalorder %s30_s26, 2  ;;  %p164_p1 = scmp.ne.s32.totalorder %s693_s20, %s689_s19 }
   0x7   : > { %p165_p2 = scmp.eq.s32.totalorder %s533_s24, 1  ;;  %p170_p3 = scmp.ne.s32.totalorder %s689_s19, %s685_s18 }
   0x8   : > { %s972_s26 = smov (%p32_p0, %s30_s26), 0  ;;  %p171_p5 = scmp.eq.s32.totalorder %s534_s25, 1 }
   0x9   : > { %p781_p4 = por %p165_p2, %p164_p1  ;;  %s151_s29 = ssub.s32 %s701_s22, %s972_s26 }
   0xa   : > { %p538_p6 = scmp.ge.s32.totalorder %s705_s23, 1  ;;  %p152_p7 = scmp.eq.s32.totalorder %s151_s29, 0 }
   0xb   : > { %p788_p8 = por %p171_p5, %p170_p3  ;;  %p220_p9 = scmp.lt.s32.totalorder %s705_s23, 3 }
   0xc   : > { %s794_s6 = scalar_select %p152_p7, %s693_s20, %s154_s27  }
   0xd   : > { %p221_p10 = pnand %p538_p6, %p220_p9 }
   0xe   : > { %p258_p11 = scmp.lt.s32.totalorder (!%p221_p10), %s697_s21, 1  ;;  %s550_s13 = sshll.u32 (!%p221_p10), %s697_s21, 4 }
   0xf   : > { %224 = sbr.rel (%p221_p10) target bundleno = 352 (0x160), region = 40  ;;  %s647_s12 = scalar_lea.hbm (!%p221_p10), %s963_s5, 32 }
  0x14   : > { %v301_v0 = vld [vmem:[%s959_s1 + $0x78] sm:$0xff]  ;;  %v300_v2 = vld [vmem:[%s959_s1 + $0x70] sm:$0xff]  ;;  %v299_v4 = vld [vmem:[%s959_s1 + $0x68] sm:$0xff]  ;;  %s259_s29 = scalar_select %p258_p11, %s697_s21, 1  ;;  %vm277_vm0 = vcmask 588800   ;;  %v707_v36 = vmov 0.0  }
  0x15   : > { %v317_v1 = vld [vmem:[%s959_s1 + $0xf8] sm:$0xff]  ;;  %318 = vmatpush.msra.mxu0 %v301_v0  ;;  %v316_v3 = vld [vmem:[%s959_s1 + $0xf0] sm:$0xff]  ;;  %551 = vmatpush.msra.mxu3 %v301_v0  ;;  %v315_v5 = vld [vmem:[%s959_s1 + $0xe8] sm:$0xff]  ;;  %278 = vst.msk [vmem:[#allocation2] sm:$0xff] %vm277_vm0, %v707_v36  ;;  %v708_v37 = vmov 0   ;;  %vm388_vm1 = vcmask 130048  }
  0x16   : > { %341 = vmatpush.msra.mxu1 %v317_v1  ;;  %v298_v6 = vld [vmem:[%s959_s1 + $0x60] sm:$0xff]  ;;  %v297_v8 = vld [vmem:[%s959_s1 + $0x58] sm:$0xff]  ;;  %v296_v10 = vld [vmem:[%s959_s1 + $0x50] sm:$0xff]  ;;  %s549_s15 = sshll.u32 %s259_s29, 5  ;;  %279 = vst.msk [vmem:[#allocation2 + $0x8] sm:$0xff] %vm277_vm0, %v707_v36  ;;  %626 = vset.pattern.permute.xlu0 %v708_v37  ;;  %s254_s29 = sand.u32 1, %s689_s19  }
  0x17   : > { %319 = vmatpush.msra.mxu0 %v300_v2  ;;  %552 = vmatpush.msra.mxu3 %v300_v2  ;;  %v314_v7 = vld [vmem:[%s959_s1 + $0xe0] sm:$0xff]  ;;  %v313_v9 = vld [vmem:[%s959_s1 + $0xd8] sm:$0xff]  ;;  %v312_v11 = vld [vmem:[%s959_s1 + $0xd0] sm:$0xff]  ;;  %s265_s11 = scalar_lea.vmem %s958_s0, %s549_s15  ;;  %s539_s10 = sshll.u32 %s254_s29, 4 }
  0x18   : > { %342 = vmatpush.msra.mxu1 %v316_v3  ;;  %v295_v12 = vld [vmem:[%s959_s1 + $0x48] sm:$0xff]  ;;  %v294_v14 = vld [vmem:[%s959_s1 + $0x40] sm:$0xff]  ;;  %v293_v16 = vld [vmem:[%s959_s1 + $0x38] sm:$0xff]  ;;  %s438_s15 = scalar_lea.hbm %s963_s5, %s550_s13  ;;  %s256_s17 = scalar_lea.vmem [#allocation3], %s539_s10 }
  0x19   : > { %320 = vmatpush.msra.mxu0 %v299_v4  ;;  %553 = vmatpush.msra.mxu3 %v299_v4  ;;  %v311_v13 = vld [vmem:[%s959_s1 + $0xc8] sm:$0xff]  ;;  %v310_v15 = vld [vmem:[%s959_s1 + $0xc0] sm:$0xff]  ;;  %v309_v17 = vld [vmem:[%s959_s1 + $0xb8] sm:$0xff]  ;;  %s439_s24 = sshll.u32 %s256_s17, 4  ;;  %s441_s25 = sshll.u32 %s438_s15, 4  ;;  %s440_s24 = int_to_ptr.vmem [resolvable:$true] %s439_s24  ;;  %s442_s25 = int_to_ptr.hbm [resolvable:$true] %s441_s25 }
  0x1a   : > { %343 = vmatpush.msra.mxu1 %v315_v5  ;;  %v292_v18 = vld [vmem:[%s959_s1 + $0x30] sm:$0xff]  ;;  %v291_v20 = vld [vmem:[%s959_s1 + $0x28] sm:$0xff]  ;;  %v290_v22 = vld [vmem:[%s959_s1 + $0x20] sm:$0xff]  ;;  %s427_s21 = scalar_lea.sflag [#allocation4], %s254_s29  ;;  %s641_s8 = sshra.s32 %s442_s25, 4  ;;  %s642_s8 = int_to_ptr.hbm [resolvable:$true] %s641_s8 }
  0x1b   : > { %321 = vmatpush.msra.mxu0 %v298_v6  ;;  %554 = vmatpush.msra.mxu3 %v298_v6  ;;  %v308_v19 = vld [vmem:[%s959_s1 + $0xb0] sm:$0xff]  ;;  %v307_v21 = vld [vmem:[%s959_s1 + $0xa8] sm:$0xff]  ;;  %v306_v23 = vld [vmem:[%s959_s1 + $0xa0] sm:$0xff]  ;;  %s643_s9 = scalar_lea.hbm %s642_s8, 16  ;;  %p648_p1 = scmp.lt.s32.totalorder %s642_s8, %s963_s5 }
  0x1c   : > { %344 = vmatpush.msra.mxu1 %v314_v7  ;;  %v289_v24 = vld [vmem:[%s959_s1 + $0x18] sm:$0xff]  ;;  %v288_v26 = vld [vmem:[%s959_s1 + $0x10] sm:$0xff]  ;;  %v287_v28 = vld [vmem:[%s959_s1 + $0x8] sm:$0xff]  ;;  %p644_p12 = scmp.ne.s32.totalorder %s642_s8, %s643_s9  ;;  %p649_p2 = scmp.lt.s32.totalorder %s647_s12, %s643_s9 }
  0x1d   : > { %322 = vmatpush.msra.mxu0 %v297_v8  ;;  %555 = vmatpush.msra.mxu3 %v297_v8  ;;  %v305_v25 = vld [vmem:[%s959_s1 + $0x98] sm:$0xff]  ;;  %v304_v27 = vld [vmem:[%s959_s1 + $0x90] sm:$0xff]  ;;  %v303_v29 = vld [vmem:[%s959_s1 + $0x88] sm:$0xff] }
  0x1e   : > { %345 = vmatpush.msra.mxu1 %v313_v9  ;;  %v286_v30 = vld [vmem:[%s959_s1] sm:$0xff]  ;;  %v283_v33 = vld [vmem:[%s265_s11 + $0x8] sm:$0xff]  ;;  %v284_v34 = vld [vmem:[%s265_s11 + $0x10] sm:$0xff]  ;;  %p645_p13 = pnand %p644_p12, %p781_p4  ;;  %p650_p3 = por %p649_p2, %p648_p1 }
  0x1f   : > { %323 = vmatpush.msra.mxu0 %v296_v10  ;;  %556 = vmatpush.msra.mxu3 %v296_v10  ;;  %v302_v31 = vld [vmem:[%s959_s1 + $0x80] sm:$0xff]  ;;  %v285_v35 = vld [vmem:[%s265_s11 + $0x18] sm:$0xff]  ;;  %v377_v44 = vld [vmem:[%s961_s3 + $0x8] sm:$0xff] }
  0x20   : > { %346 = vmatpush.msra.mxu1 %v312_v11  ;;  %v282_v32 = vld [vmem:[%s265_s11] sm:$0xff]  ;;  %v281_v46 = vld [vmem:[#allocation2 + $0x8] sm:$0xff]  ;;  %p646_p0 = pneg %p645_p13 }
  0x21   : > { %324 = vmatpush.msra.mxu0 %v295_v12  ;;  %557 = vmatpush.msra.mxu3 %v295_v12  ;;  %v280_v39 = vld [vmem:[#allocation2] sm:$0xff]  ;;  %v373_v53 = vld [vmem:[%s960_s2 + $0x8] sm:$0xff] }
  0x22   : > { %347 = vmatpush.msra.mxu1 %v311_v13  ;;  %v376_v41 = vld [vmem:[%s961_s3] sm:$0xff]  ;;  %v421_v63 = vld [vmem:[%s962_s4 + $0x8] sm:$0xff]  ;;  %p651_p5 = pnand %p650_p3, %p646_p0 }
  0x23   : > { %325 = vmatpush.msra.mxu0 %v294_v14  ;;  %558 = vmatpush.msra.mxu3 %v294_v14  ;;  %v372_v51 = vld [vmem:[%s960_s2] sm:$0xff] }
  0x24   : > { %348 = vmatpush.msra.mxu1 %v310_v15  ;;  %380 = vperm.xlu0 %626, %v376_v41   ;;  %v420_v57 = vld [vmem:[%s962_s4] sm:$0xff] }
  0x25   : > { %326 = vmatpush.msra.mxu0 %v293_v16  ;;  %559 = vmatpush.msra.mxu3 %v293_v16 }
  0x26   : > { %349 = vmatpush.msra.mxu1 %v309_v17 }
  0x27   : > { %327 = vmatpush.msra.mxu0 %v292_v18  ;;  %560 = vmatpush.msra.mxu3 %v292_v18 }
  0x28   : > { %350 = vmatpush.msra.mxu1 %v308_v19 }
  0x29   : > { %328 = vmatpush.msra.mxu0 %v291_v20  ;;  %561 = vmatpush.msra.mxu3 %v291_v20 }
  0x2a   : > { %351 = vmatpush.msra.mxu1 %v307_v21 }
  0x2b   : > { %329 = vmatpush.msra.mxu0 %v290_v22  ;;  %562 = vmatpush.msra.mxu3 %v290_v22 }
  0x2c   : > { %352 = vmatpush.msra.mxu1 %v306_v23  ;;  %385 = vperm.xlu0 %626, %v377_v44  }
  0x2d   : > { %330 = vmatpush.msra.mxu0 %v289_v24  ;;  %563 = vmatpush.msra.mxu3 %v289_v24 }
  0x2e   : > { %353 = vmatpush.msra.mxu1 %v305_v25 }
  0x2f   : > { %331 = vmatpush.msra.mxu0 %v288_v26  ;;  %564 = vmatpush.msra.mxu3 %v288_v26 }
  0x30   : > { %354 = vmatpush.msra.mxu1 %v304_v27 }
  0x31   : > { %332 = vmatpush.msra.mxu0 %v287_v28  ;;  %565 = vmatpush.msra.mxu3 %v287_v28 }
  0x32   : > { %355 = vmatpush.msra.mxu1 %v303_v29 }
  0x33   : > { %333 = vmatpush.msra.mxu0 %v286_v30  ;;  %566 = vmatpush.msra.mxu3 %v286_v30 }
  0x34   : > { %356 = vmatpush.msra.mxu1 %v302_v31  ;;  %334 = vmatmul.f32.vlgmr.msra.gmra.mxu0 %v282_v32 }
  0x35   : > { %357 = vmatmul.f32.vlgmr.msra.gmra.mxu1 %v283_v33  ;;  %337 = vmatmul.f32.vlgmr.msra.gmra.mxu3 %v284_v34 }
  0x3d   : > { %360 = vmatmul.f32.gmra.mxu1 %v285_v35 }
  0x96   : > { %v381_v54 = vpop.permute.xlu0 %380 }
  0x9e   : > { %v386_v60 = vpop.permute.xlu0 %385 }
  0xb1   : > { %v335_v38 = vpop.f32.mrf.mxu0 }
  0xb2   : > { %v358_v40 = vpop.f32.mrf.mxu1 }
  0xb3   : > { %v359_v42 = vadd.f32 %v358_v40, %v335_v38 }
  0xb5   : > { %v364_v43 = vadd.f32 %v359_v42, %v280_v39 }
  0xb7   : > { %367 = vst.msk [vmem:[#allocation2] sm:$0xff] %vm277_vm0, %v364_v43 }
  0xb8   : > { %v338_v45 = vpop.f32.mrf.mxu3 }
  0xba   : > { %v361_v47 = vpop.f32.mrf.mxu1 }
  0xbb   : > { %v362_v48 = vadd.f32 %v361_v47, %v338_v45 }
  0xbd   : > { %v365_v49 = vadd.f32 %v362_v48, %v281_v46 }
  0xbe   : > { %v374_v52 = vld [vmem:[#allocation2] sm:$0xff] }
  0xbf   : > { %368 = vst.msk [vmem:[#allocation2 + $0x8] sm:$0xff] %vm277_vm0, %v365_v49 }
  0xc6   : > { %v375_v50 = vld [vmem:[#allocation2 + $0x8] sm:$0xff] }
  0xc7   : > { %409 = vmatpush.msra.mxu2 %v375_v50 }
  0xc9   : > { %410 = vmatpush.msra.mxu2 %v374_v52 }
  0xca   : > { %542 = vmatmul.msk.f32.vlgmr.msra.gmra.mxu2 %vm388_vm1, %v372_v51 }
  0xd2   : > { %543 = vmatmul.msk.f32.gmra.mxu2 %vm388_vm1, %v373_v53 }
 0x14d   : > { %v412_v55 = vpop.f32.mrf.mxu2 }
 0x14e   : > { %v413_v56 = vadd.f32 %v412_v55, %v381_v54 }
 0x150   : > { %v418_v58 = vmax.f32 %v413_v56, 0.0 }
 0x152   : > { %v422_v59 = vmul.f32 %v420_v57, %v418_v58 }
 0x154   : > { %424 = vst.msk [vmem:[%s256_s17] sm:$0xff] %vm277_vm0, %v422_v59 }
 0x155   : > { %v415_v61 = vpop.f32.mrf.mxu2 }
 0x156   : > { %v416_v62 = vadd.f32 %v415_v61, %v386_v60 }
 0x158   : > { %v419_v0 = vmax.f32 %v416_v62, 0.0 }
 0x15a   : > { %v423_v1 = vmul.f32 %v421_v63, %v419_v0 }
 0x15c   : > { %425 = vst.msk [vmem:[%s256_s17 + $0x8] sm:$0xff] %vm277_vm0, %v423_v1 }
 0x15d   : > { %654 = shalt.err (!%p651_p5)
}
 0x15e   : > { %s709_s29 = smov 128   ;;  %s710_s16 = smov 8  }
 0x15f   : > { %567 = dma.vmem_to_hbm [thread:$0]  (%p781_p4), %s440_s24, 256, %s442_s25, %s427_s21, %s709_s29, %s709_s29, %s710_s16  }
 0x160 PF: > { %p573_p6 = scmp.ge.s32.totalorder %s705_s23, 2  ;;  %s456_s15 = sand.u32 1, %s685_s18  }
 0x161   : > { %s457_s17 = scalar_lea.sflag [#allocation4], %s456_s15 }
 0x162   : > { %p570_p7 = pnand %p573_p6, %p788_p8 }
 0x164   : > { %p571_p9 = pneg %p570_p7 }
 0x166   : > { %680 = dma.done.wait (%p571_p9), %s457_s17, 256  }
 0x167   : > { %682 = vsyncadd (%p571_p9), %s457_s17, 4294967040  ;;  %s18_s23 = sadd.s32 1, %s705_s23   ;;  %s966_s18 = smov %s689_s19 }
 0x168   : > { %p15_p10 = scmp.ge.s32.totalorder %s18_s23, 4   ;;  %s967_s19 = smov %s693_s20 }
 0x169   : > { %s968_s20 = smov %s794_s6  ;;  %s969_s21 = smov %s701_s22 }
 0x16a   : > { %s970_s22 = smov %s972_s26  ;;  %17 = sbr.rel (!%p15_p10) target bundleno = 4 (0x4), region = 86 }
 0x16f   :  { %463 = vsyncpa [#allocation4], 1 }
 0x170   :  { %465 = vsyncpa [#allocation4 + $0x1], 1 }

</bundles_post_ra>
